<compile_context>
chip_gen: v7x
topology: tpu7x:2x2x1
jax: 0.10.0
libtpu: 0.0.40
codegen_flags: <defaults>
</compile_context>

<pallas_src>
import jax
import jax.numpy as jnp
from jax.experimental import pallas as pl
from jax.experimental.pallas import tpu as pltpu


# ---------------------------------------------------------------------------
# Fused 3-layer MLP kernel, feature-major layout.
#   xt_ref : (4, TB)                x^T batch tile (batch on lanes)
#   p_ref  : (16, 23 + OD)          packed params:
#            cols [0:4]   w1 (16,4)      col  [4]      b1 (16,1)
#            cols [5:21]  w2 (16,16)     col  [21]     b2 (16,1)
#            cols [22:22+OD] w3^T (16,OD)
#            col  [22+OD] rows [0:OD]    b3 (OD,1)
#   o_ref  : (OD, TB)
# ---------------------------------------------------------------------------
def _over_proj_kernel(xt_ref, p_ref, o_ref):
    out_dim = o_ref.shape[0]

    xt = xt_ref[...]                                   # (4, TB)
    w1 = p_ref[:, 0:4]                                 # (16, 4)
    b1 = p_ref[:, 4:5]                                 # (16, 1)
    w2 = p_ref[:, 5:21]                                # (16, 16)
    b2 = p_ref[:, 21:22]                               # (16, 1)
    w3t = p_ref[:, 22:22 + out_dim]                    # (16, OD)
    b3 = p_ref[0:out_dim, 22 + out_dim:23 + out_dim]   # (OD, 1)

    # linear1 + ReLU   (MXU: (16,4) @ (4,TB))
    h = jnp.dot(w1, xt, preferred_element_type=jnp.float32)
    h = jnp.maximum(h + b1, 0.0)                       # (16, TB)

    # linear2 + ReLU   (MXU: (16,16) @ (16,TB))
    h = jnp.dot(w2, h, preferred_element_type=jnp.float32)
    h = jnp.maximum(h + b2, 0.0)                       # (16, TB)

    # linear3: off the MXU -- VPU multiply + sublane (XLU) reduction.
    if out_dim == 1:
        out = jnp.sum(h * w3t, axis=0, keepdims=True)  # (1, TB)
    else:  # projection_axis == both (OD == 2)
        out = jnp.concatenate(
            [jnp.sum(h * w3t[:, o:o + 1], axis=0, keepdims=True)
             for o in range(out_dim)],
            axis=0)                                    # (OD, TB)

    o_ref[...] = out + b3                              # lane-dense store


# ---------------------------------------------------------------------------
# Tiling / generation helpers.
# ---------------------------------------------------------------------------
def _round_up(a, b):
    return ((a + b - 1) // b) * b


def _cdiv(a, b):
    return (a + b - 1) // b


def _tpu_defaults():
    """(max_block_lanes, vmem_limit_bytes, tensorcores_per_chip)."""
    kind = ""
    try:
        kind = jax.devices()[0].device_kind.lower()
    except Exception:
        pass
    if "v7" in kind:
        # 64 MiB VMEM per TC, 2 TCs/chip -> smaller tiles, keep >=2 grid steps.
        return 32768, 40 * 1024 * 1024, 2
    if ("v6" in kind) or ("v5e" in kind) or ("v5 lite" in kind) or ("v5lite" in kind):
        # 128 MiB VMEM, single TC -> go wide.
        return 65536, 64 * 1024 * 1024, 1
    # Unknown generation: conservative.
    return 32768, 32 * 1024 * 1024, 1


def _choose_tiling(B, block_b, max_block, num_tc):
    """Pick (block_b, n_blocks). Sizes from n_blocks first (v7x megacore),
    keeps block_b a multiple of 128 (or == B for a single full-array block)."""
    if block_b is not None:                   # explicit override
        if block_b >= B:
            return B, 1                       # single full-extent block (legal: == dim)
        block_b = max(128, _round_up(block_b, 128))
        return block_b, _cdiv(B, block_b)

    b128 = max(128, _round_up(B, 128))
    n_blocks = _cdiv(b128, max_block)
    if num_tc > 1 and b128 >= 128 * num_tc:
        # Keep both v7x TensorCores busy and balanced.
        n_blocks = _round_up(max(n_blocks, num_tc), num_tc)
    if n_blocks <= 1:
        return B, 1                           # single block == full array dims
    block_b = max(128, _round_up(_cdiv(B, n_blocks), 128))
    return block_b, _cdiv(B, block_b)


def _pack_params(params, out_dim):
    """Pack all weights/biases into one (16, 23 + out_dim) f32 array."""
    w1 = params["w1"].astype(jnp.float32)                         # (16, 4)
    b1 = params["b1"].astype(jnp.float32).reshape(16, 1)          # (16, 1)
    w2 = params["w2"].astype(jnp.float32)                         # (16, 16)
    b2 = params["b2"].astype(jnp.float32).reshape(16, 1)          # (16, 1)
    w3t = params["w3"].astype(jnp.float32).T                      # (16, OD)
    b3col = jnp.zeros((16, 1), jnp.float32).at[:out_dim, 0].set(
        params["b3"].astype(jnp.float32).reshape(-1))             # (16, 1)
    return jnp.concatenate([w1, b1, w2, b2, w3t, b3col], axis=1)  # (16, 23+OD)


# ---------------------------------------------------------------------------
# Public wrapper.
# ---------------------------------------------------------------------------
def over_proj_net_s(x, params, *, block_b=None, feature_major=False):
    """Forward pass of OverProjNetS via a fused Pallas kernel.

    x: (B, 4) float32, or (4, B) if feature_major=True (preferred: avoids an
       extra HBM relayout pass).
    params: PyTorch-layout parameters:
        w1 (16, 4), b1 (16,), w2 (16, 16), b2 (16,), w3 (out, 16), b3 (out,)
    Returns (B, out) float32 (out == 1 for projection_axis=x).
    """
    if feature_major:
        fin, B = x.shape
        xt = x.astype(jnp.float32)                                # (4, B)
    else:
        B, fin = x.shape
        # NOTE: this transpose is a full HBM relayout pass and is the
        # end-to-end ceiling for large batches; prefer feature_major=True.
        xt = x.astype(jnp.float32).T                              # (4, B)
    assert fin == 4, f"expected 4 input features, got {fin}"

    out_dim = params["w3"].shape[0]
    pack = _pack_params(params, out_dim)                          # (16, 23+OD)

    max_block, vmem_limit, num_tc = _tpu_defaults()
    tb, n_blocks = _choose_tiling(B, block_b, max_block, num_tc)

    out = pl.pallas_call(
        _over_proj_kernel,
        out_shape=jax.ShapeDtypeStruct((out_dim, B), jnp.float32),
        grid_spec=pltpu.PrefetchScalarGridSpec(
            num_scalar_prefetch=0,
            grid=(n_blocks,),
            in_specs=[
                pl.BlockSpec((4, tb), lambda i: (0, i)),          # x^T tile
                pl.BlockSpec((16, 23 + out_dim), lambda i: (0, 0)),  # packed params
            ],
            out_specs=pl.BlockSpec((out_dim, tb), lambda i: (0, i)),
        ),
        compiler_params=pltpu.CompilerParams(
            dimension_semantics=("parallel",),
            vmem_limit_bytes=vmem_limit,
        ),
    )(xt, pack)

    # Back to PyTorch convention: (B, out_dim).
    return out.T


# ---------------------------------------------------------------------------
# Deterministic parameter init (PyTorch nn.Linear default:
# U(-1/sqrt(fan_in), 1/sqrt(fan_in)) for weight and bias), PyTorch layout.
# ---------------------------------------------------------------------------
def init_params(key, out_dim=1):
    def linear(k, fan_in, fan_out):
        kw, kb = jax.random.split(k)
        bound = 1.0 / jnp.sqrt(fan_in)
        w = jax.random.uniform(kw, (fan_out, fan_in), jnp.float32, -bound, bound)
        b = jax.random.uniform(kb, (fan_out,), jnp.float32, -bound, bound)
        return w, b

    k1, k2, k3 = jax.random.split(key, 3)
    w1, b1 = linear(k1, 4, 16)
    w2, b2 = linear(k2, 16, 16)
    w3, b3 = linear(k3, 16, out_dim)   # projection_axis = x -> out_dim = 1
    return dict(w1=w1, b1=b1, w2=w2, b2=b2, w3=w3, b3=b3)


def _reference(x, p):
    h = jnp.maximum(x @ p["w1"].T + p["b1"], 0.0)
    h = jnp.maximum(h @ p["w2"].T + p["b2"], 0.0)
    return h @ p["w3"].T + p["b3"]


if __name__ == "__main__":
    key = jax.random.PRNGKey(0)
    kx, kp, kx2, kx3, kp2, kx4 = jax.random.split(key, 6)
    params = init_params(kp)

    # 1) Small batch: single ragged block (16 valid lanes), masked writeback.
    B = 16
    x = jax.random.normal(kx, (B, 4), jnp.float32)
    out = jax.block_until_ready(over_proj_net_s(x, params))
    ref = _reference(x, params)
    assert out.shape == (B, 1), out.shape
    assert jnp.allclose(out, ref, atol=1e-4, rtol=1e-4), "mismatch (small batch)"

    # 2) Forced small tile: multi-step grid + ragged last block (no zero-pad).
    B2 = 1000
    x2 = jax.random.normal(kx2, (B2, 4), jnp.float32)
    out2 = jax.block_until_ready(over_proj_net_s(x2, params, block_b=256))
    ref2 = _reference(x2, params)
    assert out2.shape == (B2, 1), out2.shape
    assert jnp.allclose(out2, ref2, atol=1e-4, rtol=1e-4), "mismatch (multi-block)"

    # 3) Auto (generation-aware) tiling on a non-multiple batch.
    B3 = 8200
    x3 = jax.random.normal(kx3, (B3, 4), jnp.float32)
    out3 = jax.block_until_ready(over_proj_net_s(x3, params))
    ref3 = _reference(x3, params)
    assert out3.shape == (B3, 1), out3.shape
    assert jnp.allclose(out3, ref3, atol=1e-4, rtol=1e-4), "mismatch (auto tiling)"

    # 4) projection_axis = both (out_dim = 2) path.
    params2 = init_params(kp2, out_dim=2)
    B4 = 300
    x4 = jax.random.normal(kx4, (B4, 4), jnp.float32)
    out4 = jax.block_until_ready(over_proj_net_s(x4, params2))
    ref4 = _reference(x4, params2)
    assert out4.shape == (B4, 2), out4.shape
    assert jnp.allclose(out4, ref4, atol=1e-4, rtol=1e-4), "mismatch (out_dim=2)"

    print("KERNEL_OK")
</pallas_src>

<mosaic_0001>
module attributes {stable_mosaic.version = 11 : i64} {
  func.func @_over_proj_kernel(%arg0: i32, %arg1: memref<4x16xf32, #tpu.memory_space<vmem>>, %arg2: memref<16x24xf32, #tpu.memory_space<vmem>>, %arg3: memref<1x16xf32, #tpu.memory_space<vmem>>) attributes {dimension_semantics = [#tpu.dimension_semantics<parallel>], iteration_bounds = array<i64: 1>, scalar_prefetch = 0 : i64, scratch_operands = 0 : i64, tpu.core_type = #tpu.core_type<tc>, window_params = [{transform_indices = @transform_0, window_bounds = array<i64: 4, 16>}, {pipeline_mode = #tpu.pipeline_mode<synchronous>, transform_indices = @transform_1, window_bounds = array<i64: 16, 24>}, {transform_indices = @transform_2, window_bounds = array<i64: 1, 16>}]} {
    %c0 = arith.constant 0 : index
    %c0_0 = arith.constant 0 : index
    %0 = vector.load %arg1[%c0, %c0_0] : memref<4x16xf32, #tpu.memory_space<vmem>>, vector<4x16xf32>
    %c0_1 = arith.constant 0 : index
    %c0_2 = arith.constant 0 : index
    %1 = vector.load %arg2[%c0_1, %c0_2] : memref<16x24xf32, #tpu.memory_space<vmem>>, vector<16x4xf32>
    %c0_3 = arith.constant 0 : index
    %c4 = arith.constant 4 : index
    %2 = vector.load %arg2[%c0_3, %c4] : memref<16x24xf32, #tpu.memory_space<vmem>>, vector<16x1xf32>
    %c0_4 = arith.constant 0 : index
    %c5 = arith.constant 5 : index
    %3 = vector.load %arg2[%c0_4, %c5] : memref<16x24xf32, #tpu.memory_space<vmem>>, vector<16x16xf32>
    %c0_5 = arith.constant 0 : index
    %c21 = arith.constant 21 : index
    %4 = vector.load %arg2[%c0_5, %c21] : memref<16x24xf32, #tpu.memory_space<vmem>>, vector<16x1xf32>
    %c0_6 = arith.constant 0 : index
    %c22 = arith.constant 22 : index
    %5 = vector.load %arg2[%c0_6, %c22] : memref<16x24xf32, #tpu.memory_space<vmem>>, vector<16x1xf32>
    %c0_7 = arith.constant 0 : index
    %c23 = arith.constant 23 : index
    %6 = vector.load %arg2[%c0_7, %c23] : memref<16x24xf32, #tpu.memory_space<vmem>>, vector<1x1xf32>
    %cst = arith.constant dense<0.000000e+00> : vector<16x16xf32>
    %7 = tpu.matmul %1, %0, %cst {dimension_numbers = #tpu.dot_dimension_numbers<[1], [0], [0], [1], [0, 0, 1, 1], [], []>} : vector<16x4xf32>, vector<4x16xf32>, vector<16x16xf32> -> vector<16x16xf32>
    %8 = vector.broadcast %2 : vector<16x1xf32> to vector<16x16xf32>
    %9 = arith.addf %7, %8 : vector<16x16xf32>
    %cst_8 = arith.constant 0.000000e+00 : f32
    %10 = vector.broadcast %cst_8 : f32 to vector<16x16xf32>
    %11 = arith.maximumf %9, %10 : vector<16x16xf32>
    %cst_9 = arith.constant dense<0.000000e+00> : vector<16x16xf32>
    %12 = tpu.matmul %3, %11, %cst_9 {dimension_numbers = #tpu.dot_dimension_numbers<[1], [0], [0], [1], [0, 0, 1, 1], [], []>} : vector<16x16xf32>, vector<16x16xf32>, vector<16x16xf32> -> vector<16x16xf32>
    %13 = vector.broadcast %4 : vector<16x1xf32> to vector<16x16xf32>
    %14 = arith.addf %12, %13 : vector<16x16xf32>
    %cst_10 = arith.constant 0.000000e+00 : f32
    %15 = vector.broadcast %cst_10 : f32 to vector<16x16xf32>
    %16 = arith.maximumf %14, %15 : vector<16x16xf32>
    %17 = vector.broadcast %5 : vector<16x1xf32> to vector<16x16xf32>
    %18 = arith.mulf %16, %17 : vector<16x16xf32>
    %cst_11 = arith.constant dense<0.000000e+00> : vector<16xf32>
    %19 = vector.multi_reduction <add>, %18, %cst_11 [0] : vector<16x16xf32> to vector<16xf32>
    %20 = vector.shape_cast %19 : vector<16xf32> to vector<1x16xf32>
    %21 = vector.broadcast %6 : vector<1x1xf32> to vector<1x16xf32>
    %22 = arith.addf %20, %21 : vector<1x16xf32>
    %c0_12 = arith.constant 0 : index
    %c0_13 = arith.constant 0 : index
    %23 = vector.load %arg3[%c0_12, %c0_13] : memref<1x16xf32, #tpu.memory_space<vmem>>, vector<1x16xf32>
    tpu.vector_store %arg3[%c0_12, %c0_13], %22 {strides = array<i32>} : memref<1x16xf32, #tpu.memory_space<vmem>>, vector<1x16xf32>,
    return
  }
  func.func @transform_0(%arg0: i32) -> (i32, i32) {
    %c0_i32 = arith.constant 0 : i32
    %c0_i32_0 = arith.constant 0 : i32
    return %c0_i32, %arg0 : i32, i32
  }
  func.func @transform_1(%arg0: i32) -> (i32, i32) {
    %c0_i32 = arith.constant 0 : i32
    %c0_i32_0 = arith.constant 0 : i32
    %c0_i32_1 = arith.constant 0 : i32
    return %c0_i32, %c0_i32_0 : i32, i32
  }
  func.func @transform_2(%arg0: i32) -> (i32, i32) {
    %c0_i32 = arith.constant 0 : i32
    %c0_i32_0 = arith.constant 0 : i32
    return %c0_i32, %arg0 : i32, i32
  }
}

</mosaic_0001>

<bundles_post_ra>
// kernel: tpu_custom_call.1
= control target key start
LH: loop header
LB: loop body
LE: loop exit
PB: predicated region body
PF: predicated region fallthrough
CT: control target
= control target key end

     0   :  { %7 = vsyncpa [#allocation3], 0  ;;  %s464_s0 = inlined_call_operand.hbm [shape: f32[4,16], index: 0, kind: input, shape index: {}]   ;;  %s465_s1 = inlined_call_operand.hbm [shape: f32[16,24], index: 1, kind: input, shape index: {}]   ;;  %s466_s2 = inlined_call_operand.hbm [shape: f32[1,16], index: 2, kind: output, shape index: {}]  }
   0x1   :  { %8 = vsyncpa [#allocation6], 0 }
   0x2   :  { %9 = vsyncpa [#allocation4], 0  ;;  %s392_s9 = smov [#allocation2]   ;;  %s393_s11 = smov [#allocation5]  }
   0x3   :  { %s16_s10 = sshll.u32 %s392_s9, 4  ;;  %s25_s12 = sshll.u32 %s393_s11, 4  ;;  %s17_s10 = int_to_ptr.vmem [resolvable:$true] %s16_s10  ;;  %s417_s12 = int_to_ptr.vmem [resolvable:$true] %s25_s12 }
   0x4   :  { %s320_s15 = scalar_lea.hbm %s464_s0, 64 }
   0x5   :  { %p321_p0 = scmp.ne.s32.totalorder %s464_s0, %s320_s15  ;;  %p324_p1 = scmp.lt.u32.totalorder %s320_s15, %s464_s0 }
   0x7   :  { %p326_p2 = pnand %p324_p1, %p321_p0 }
   0x9   :  { %329 = shalt.err (!%p326_p2)
}
   0xa   :  { %s330_s20 = scalar_lea.vmem %s17_s10, 64  ;;  %p335_p4 = scmp.lt.s32.totalorder %s17_s10, %s17_s10 }
   0xb   :  { %p331_p3 = scmp.ne.s32.totalorder %s17_s10, %s330_s20  ;;  %p336_p5 = scmp.lt.s32.totalorder %s330_s20, %s330_s20 }
   0xd   :  { %p337_p6 = por %p336_p5, %p335_p4 }
   0xf   :  { %p338_p7 = pnand %p337_p6, %p331_p3 }
  0x11   :  { %341 = shalt.err (!%p338_p7)
}
  0x12   :  { %19 = dma.hbm_to_vmem [thread:$0]  %s464_s0, 64, %s17_s10, [#allocation3]  }
  0x13   :  { %s342_s25 = scalar_lea.hbm %s465_s1, 256 }
  0x14   :  { %p343_p8 = scmp.ne.s32.totalorder %s465_s1, %s342_s25  ;;  %p346_p9 = scmp.lt.u32.totalorder %s342_s25, %s465_s1 }
  0x16   :  { %p348_p10 = pnand %p346_p9, %p343_p8 }
  0x18   :  { %351 = shalt.err (!%p348_p10)
}
  0x19   :  { %s352_s30 = scalar_lea.vmem %s417_s12, 256  ;;  %p357_p12 = scmp.lt.s32.totalorder %s417_s12, %s417_s12 }
  0x1a   :  { %p353_p11 = scmp.ne.s32.totalorder %s417_s12, %s352_s30  ;;  %p358_p13 = scmp.lt.s32.totalorder %s352_s30, %s352_s30 }
  0x1c   :  { %p359_p0 = por %p358_p13, %p357_p12 }
  0x1e   :  { %p360_p1 = pnand %p359_p0, %p353_p11 }
  0x20   :  { %363 = shalt.err (!%p360_p1)
}
  0x21   :  { %s394_s0 = smov 128   ;;  %s395_s3 = smov 8  }
  0x22   :  { %31 = dma.hbm_to_vmem [thread:$0]  %s465_s1, 256, %s417_s12, [#allocation6], %s394_s0, %s394_s0, %s395_s3  }
  0x23   :  { %386 = dma.done.wait [#allocation3], 64  }
  0x24   :  { %387 = vsyncadd [#allocation3], 4294967232 }
  0x25   :  { %388 = dma.done.wait [#allocation6], 256  }
  0x26   :  { %389 = vsyncadd [#allocation6], 4294967040  ;;  %v396_v0 = vmov 4   ;;  %vm57_vm0 = vcmask 1043456   ;;  %vm52_vm1 = vcmask 31744   ;;  %v39_v2 = vld [vmem:[#allocation5] sm:$0xff] }
  0x27   :  { %313 = vset.pattern.permute.xlu0 %v396_v0  ;;  %v38_v1 = vld [vmem:[#allocation2] sm:$0xf]  ;;  %v40_v3 = vld [vmem:[#allocation5 + $0x8] sm:$0xff]  ;;  %289 = vmatprep.mubr.msk.f32.mxu0 %vm52_vm1, %v39_v2  ;;  %s397_s6 = smov 123   ;;  %v398_v4 = vmov 21   ;;  %v399_v5 = vmov 22  }
  0x28   :  { %287 = vmatprep.subr.msk.mxu0 %vm57_vm0, %v38_v1  ;;  %44 = vperm.xlu0 %313, %v39_v2   ;;  %v41_v6 = vld [vmem:[#allocation5] sm:$0x1]  ;;  %v400_v7 = vmov 23   ;;  %vm150_vm2 = vcmask 130048   ;;  %s401_s1 = smov [#allocation7]   ;;  %vm257_vm3 = vcmask 122880  }
  0x29   :  { %288 = vmatpush3.msk.msra.mxu0 %vm57_vm0, %v38_v1  ;;  %146 = vrot.lane.b32.xlu1 %v39_v2, %s397_s6  ;;  %s265_s7 = sshll.u32 %s401_s1, 4  ;;  %s266_s7 = int_to_ptr.vmem [resolvable:$true] %s265_s7 }
  0x2a   :  { %290 = vmatmul.mubr.msk.f32.vlgmr.msra.gmra.mrb[0].mxu0 %vm52_vm1, %v40_v3  ;;  %315 = vset.pattern.permute.xlu1 %v398_v4  ;;  %s364_s8 = scalar_lea.vmem %s266_s7, 16  ;;  %s368_s9 = scalar_lea.vmem %s266_s7, 32 }
  0x2b   :  { %p365_p2 = scmp.ne.s32.totalorder %s266_s7, %s364_s8  ;;  %p369_p3 = scmp.lt.s32.totalorder %s266_s7, %s266_s7 }
  0x2c   :  { %49 = vperm.xlu0 %313, %v40_v3   ;;  %p370_p4 = scmp.lt.s32.totalorder %s368_s9, %s364_s8 }
  0x2d   :  { %148 = vrot.lane.b32.xlu1 %v40_v3, %s397_s6 }
  0x2e   :  { %p371_p5 = por %p370_p4, %p369_p3 }
  0x30   :  { %314 = vset.pattern.permute.xlu0 %v398_v4  ;;  %p372_p6 = pnand %p371_p5, %p365_p2 }
  0x31   :  { %139 = vperm.xlu0 %314, %v39_v2   ;;  %143 = vperm.xlu1 %315, %v40_v3  }
  0x35   :  { %317 = vset.pattern.permute.xlu0 %v399_v5  ;;  %316 = vset.pattern.permute.xlu1 %v399_v5 }
  0x36   :  { %237 = vperm.xlu0 %317, %v40_v3   ;;  %233 = vperm.xlu1 %316, %v39_v2  }
  0x3a   :  { %318 = vset.pattern.permute.xlu1 %v400_v7  ;;  %319 = vset.pattern.permute.xlu0 %v400_v7 }
  0x3b   :  { %253 = vperm.xlu1 %318, %v41_v6  }
  0x9b   :  { %v147_v8 = vpop.permute.xlu1 %146 }
  0x9c   :  { %296 = vmatprep.mubr.msk.f32.mxu1 %vm150_vm2, %v147_v8 }
  0x9f   :  { %v149_v18 = vpop.permute.xlu1 %148 }
  0xa7   :  { %v45_v9 = vpop.permute.xlu0 %44 }
  0xab   :  { %v50_v10 = vpop.permute.xlu0 %49 }
  0xb0   :  { %v140_v19 = vpop.permute.xlu0 %139  ;;  %v144_v20 = vpop.permute.xlu1 %143 }
  0xb5   :  { %v238_v25 = vpop.permute.xlu0 %237  ;;  %v234_v27 = vpop.permute.xlu1 %233 }
  0xba   :  { %v254_v39 = vpop.permute.xlu1 %253 }
  0xfd   :  { %v291_v11 = vpop.f32.mrb[0].mxu0 }
  0xfe   :  { %v133_v12 = vadd.f32 %v291_v11, %v50_v10  ;;  %v127_v13 = vpop.f32.mrb[1].mxu0 }
  0xff   :  { %v128_v14 = vadd.f32 %v127_v13, %v45_v9 }
 0x100   :  { %v137_v15 = vmax.f32 %v133_v12, 0.0 }
 0x101   :  { %v136_v16 = vmax.f32 %v128_v14, 0.0 }
 0x103   :  { %v299_v17 = vpack.c.bf16 %v137_v15, %v136_v16 }
 0x105   :  { %300 = vmatprep.subr.bf16.mxu1 %v299_v17 }
 0x106   :  { %302 = vmatpush3.bf16.msra.mxu1 %v299_v17 }
 0x109   :  { %297 = vmatmul.mubr.msk.f32.vlgmr.msra.gmra.mrb[0].mxu1 %vm150_vm2, %v149_v18 }
 0x1dc   :  { %v298_v21 = vpop.f32.mrb[0].mxu1 }
 0x1dd   :  { %v227_v22 = vadd.f32 %v298_v21, %v144_v20  ;;  %v221_v23 = vpop.f32.mrb[1].mxu1 }
 0x1de   :  { %v222_v24 = vadd.f32 %v221_v23, %v140_v19 }
 0x1df   :  { %v231_v26 = vmax.f32 %v227_v22, 0.0 }
 0x1e0   :  { %v230_v28 = vmax.f32 %v222_v24, 0.0 }
 0x1e1   :  { %v241_v29 = vmul.f32 %v238_v25, %v231_v26 }
 0x1e2   :  { %v240_v30 = vmul.f32 %v234_v27, %v230_v28 }
 0x1e3   :  { %v243_v31 = vsel %vm150_vm2, %v241_v29, 0.0 }
 0x1e4   :  { %v242_v32 = vsel %vm150_vm2, %v240_v30, 0.0 }
 0x1e5   :  { %v244_v33 = vadd.f32 %v243_v31, %v242_v32 }
 0x1e7   :  { %v245_v34 = vrot.slane %v244_v33, 4 }
 0x1e9   :  { %v246_v35 = vadd.f32 %v245_v34, %v244_v33 }
 0x1eb   :  { %v247_v36 = vrot.slane %v246_v35, 2 }
 0x1ed   :  { %v248_v37 = vadd.f32 %v247_v36, %v246_v35 }
 0x1ef   :  { %v249_v38 = vrot.slane %v248_v37, 1 }
 0x1f1   :  { %v250_v40 = vadd.f32 %v249_v38, %v248_v37 }
 0x1f3   :  { %v256_v41 = vadd.f32 %v254_v39, %v250_v40 }
 0x1f5   :  { %258 = vst.msk [vmem:[#allocation7] sm:$0x1] %vm257_vm3, %v256_v41 }
 0x1f6   :  { %375 = shalt.err (!%p372_p6)
}
 0x1f7   :  { %s376_s12 = scalar_lea.hbm %s466_s2, 16 }
 0x1f8   :  { %p377_p7 = scmp.ne.s32.totalorder %s466_s2, %s376_s12  ;;  %p380_p8 = scmp.lt.u32.totalorder %s376_s12, %s466_s2 }
 0x1fa   :  { %p382_p9 = pnand %p380_p8, %p377_p7 }
 0x1fc   :  { %385 = shalt.err (!%p382_p9)
}
 0x1fd   :  { %268 = dma.vmem_to_hbm [thread:$0]  %s266_s7, 16, %s466_s2, [#allocation4]  }
 0x1fe   :  { %390 = dma.done.wait [#allocation4], 16  }
 0x1ff   :  { %391 = vsyncadd [#allocation4], 4294967280 }
 0x200   :  { %272 = vsyncpa [#allocation3], 1 }
 0x201   :  { %273 = vsyncpa [#allocation6], 1 }
 0x202   :  { %274 = vsyncpa [#allocation4], 1 }

</bundles_post_ra>
